<compile_context>
chip_gen: v6e
topology: v6e:2x2x1
jax: 0.10.0
libtpu: 0.0.40
codegen_flags: <defaults>
</compile_context>

<pallas_src>
import functools

import jax
import jax.numpy as jnp
from jax.experimental import pallas as pl
from jax.experimental.pallas import tpu as pltpu


# ---------------------------------------------------------------------------
# 1) Bidirectional GRU encoder (the `biRNN` used by Classifier.forward)
# ---------------------------------------------------------------------------
def _bigru_kernel(ids_ref, len_ref, h0_ref, tbl_ref, wx_ref, bx_ref,
                  whf_ref, bhf_ref, whb_ref, bhb_ref, o_ref, gx_ref,
                  *, S, TB, V, H):
    """One grid step: TB sequences -> (TB, 2H) final [fwd | bwd] hidden states."""
    # --- embedding gather + x-side gate projection for BOTH directions, hoisted ---------
    ids = ids_ref[...]                                              # (S*TB, 1) time-major
    iota = jax.lax.broadcasted_iota(jnp.int32, (S * TB, V), 1)
    onehot = (ids == iota).astype(jnp.float32)                      # id == -1 -> zero row
    emb = jnp.dot(onehot, tbl_ref[...], preferred_element_type=jnp.float32)      # (S*TB, E)
    gx_ref[...] = (jnp.dot(emb, wx_ref[...], preferred_element_type=jnp.float32)
                   + bx_ref[...])                                   # (S*TB, 6H)

    lens = len_ref[...]                                             # (TB, 1) int32
    h0 = h0_ref[...]                                                # (TB, 2H)
    whf = whf_ref[...]; bhf = bhf_ref[...]                          # hoisted weight loads
    whb = whb_ref[...]; bhb = bhb_ref[...]

    def cell(gx, h, wh, bh):
        gh = jnp.dot(h, wh, preferred_element_type=jnp.float32) + bh   # (TB, 3H)
        r = jax.nn.sigmoid(gx[:, 0:H] + gh[:, 0:H])
        z = jax.nn.sigmoid(gx[:, H:2 * H] + gh[:, H:2 * H])
        n = jnp.tanh(gx[:, 2 * H:3 * H] + r * gh[:, 2 * H:3 * H])
        return (1.0 - z) * n + z * h

    def fwd_body(t, h):
        base = pl.multiple_of(t * TB, TB)
        g = gx_ref[pl.ds(base, TB), :]                              # contiguous (TB, 6H)
        h_new = cell(g[:, 0:3 * H], h, whf, bhf)
        return jnp.where(lens > t, h_new, h)                        # packed-seq masking

    def bwd_body(i, h):
        t = S - 1 - i
        base = pl.multiple_of(t * TB, TB)
        g = gx_ref[pl.ds(base, TB), :]
        h_new = cell(g[:, 3 * H:6 * H], h, whb, bhb)
        return jnp.where(lens > t, h_new, h)

    h_f = jax.lax.fori_loop(0, S, fwd_body, h0[:, 0:H])
    h_b = jax.lax.fori_loop(0, S, bwd_body, h0[:, H:2 * H])
    o_ref[...] = jnp.concatenate([h_f, h_b], axis=-1)               # (TB, 2H)


def bigru_encode(x_ids, lengths, h0, emb_table, gru_params, *, tile_batch=8):
    """x_ids: (B, S) int32; lengths: (B,) int32; h0: (B, 2H) initial hidden [fwd | bwd]."""
    (w_ih_f, w_hh_f, b_ih_f, b_hh_f, w_ih_b, w_hh_b, b_ih_b, b_hh_b) = gru_params
    B, S = x_ids.shape
    V, E = emb_table.shape
    H = w_hh_f.shape[1]

    if B <= tile_batch:
        TB, num_tiles = B, 1
    else:
        TB = tile_batch
        assert TB % 8 == 0, "tile_batch must be a multiple of 8 when tiling the batch"
        num_tiles = -(-B // TB)
    B_pad = num_tiles * TB

    ids = jnp.full((B_pad, S), -1, jnp.int32).at[:B].set(x_ids.astype(jnp.int32))
    lens = jnp.zeros((B_pad,), jnp.int32).at[:B].set(lengths.astype(jnp.int32))
    h0p = jnp.zeros((B_pad, 2 * H), jnp.float32).at[:B].set(h0.astype(jnp.float32))

    # Time-major packing per tile: row t*TB + b  <->  token (b, t).
    ids_tm = (ids.reshape(num_tiles, TB, S)
                 .transpose(0, 2, 1)
                 .reshape(num_tiles, S * TB, 1))
    lens_t = lens.reshape(num_tiles, TB, 1)

    # Fuse x-side weights of both directions into one (E, 6H) matrix (PyTorch: (3H, E)).
    wx = jnp.concatenate([w_ih_f.T, w_ih_b.T], axis=1).astype(jnp.float32)
    bx = jnp.concatenate([b_ih_f, b_ih_b]).reshape(1, 6 * H).astype(jnp.float32)
    whf = w_hh_f.T.astype(jnp.float32)
    bhf = b_hh_f.reshape(1, 3 * H).astype(jnp.float32)
    whb = w_hh_b.T.astype(jnp.float32)
    bhb = b_hh_b.reshape(1, 3 * H).astype(jnp.float32)

    kernel = functools.partial(_bigru_kernel, S=S, TB=TB, V=V, H=H)
    out = pl.pallas_call(
        kernel,
        out_shape=jax.ShapeDtypeStruct((B_pad, 2 * H), jnp.float32),
        grid_spec=pltpu.PrefetchScalarGridSpec(
            num_scalar_prefetch=0,
            grid=(num_tiles,),
            in_specs=[
                pl.BlockSpec((pl.Squeezed(), S * TB, 1), lambda i: (i, 0, 0)),  # ids (time-major)
                pl.BlockSpec((pl.Squeezed(), TB, 1), lambda i: (i, 0, 0)),      # lengths
                pl.BlockSpec((TB, 2 * H), lambda i: (i, 0)),                    # h0
                pl.BlockSpec((V, E), lambda i: (0, 0)),                         # embedding table
                pl.BlockSpec((E, 6 * H), lambda i: (0, 0)),                     # fused Wx (f+b)
                pl.BlockSpec((1, 6 * H), lambda i: (0, 0)),                     # fused bx
                pl.BlockSpec((H, 3 * H), lambda i: (0, 0)),                     # Whh fwd
                pl.BlockSpec((1, 3 * H), lambda i: (0, 0)),
                pl.BlockSpec((H, 3 * H), lambda i: (0, 0)),                     # Whh bwd
                pl.BlockSpec((1, 3 * H), lambda i: (0, 0)),
            ],
            out_specs=pl.BlockSpec((TB, 2 * H), lambda i: (i, 0)),
            scratch_shapes=[pltpu.VMEM((S * TB, 6 * H), jnp.float32)],
        ),
        compiler_params=pltpu.CompilerParams(dimension_semantics=("parallel",)),
    )(ids_tm, lens_t, h0p, emb_table.astype(jnp.float32),
      wx, bx, whf, bhf, whb, bhb)
    return out[:B]


# ---------------------------------------------------------------------------
# 2) Fused classifier head: Linear1 -> ReLU -> Linear2
# ---------------------------------------------------------------------------
def _head_kernel(x_ref, w1_ref, b1_ref, w2_ref, b2_ref, o_ref):
    h = jnp.dot(x_ref[...], w1_ref[...], preferred_element_type=jnp.float32) + b1_ref[...]
    h = jnp.maximum(h, 0.0)
    o_ref[...] = jnp.dot(h, w2_ref[...], preferred_element_type=jnp.float32) + b2_ref[...]


def mlp_head(x, w1, b1, w2, b2, *, num_classes, tile_batch=8):
    B, Din = x.shape
    Fh = w1.shape[0]
    C_pad = 128                       # lane-dense logits store; slice to num_classes after

    if B <= tile_batch:
        TB, num_tiles = B, 1
    else:
        TB = tile_batch
        assert TB % 8 == 0
        num_tiles = -(-B // TB)
    B_pad = num_tiles * TB
    xp = jnp.zeros((B_pad, Din), jnp.float32).at[:B].set(x.astype(jnp.float32))

    w1t = w1.T.astype(jnp.float32)                                  # (Din, Fh)
    b1r = b1.reshape(1, Fh).astype(jnp.float32)
    w2p = jnp.zeros((Fh, C_pad), jnp.float32).at[:, :num_classes].set(w2.T.astype(jnp.float32))
    b2p = jnp.zeros((1, C_pad), jnp.float32).at[:, :num_classes].set(b2.astype(jnp.float32))

    out = pl.pallas_call(
        _head_kernel,
        out_shape=jax.ShapeDtypeStruct((B_pad, C_pad), jnp.float32),
        grid_spec=pltpu.PrefetchScalarGridSpec(
            num_scalar_prefetch=0,
            grid=(num_tiles,),
            in_specs=[
                pl.BlockSpec((TB, Din), lambda i: (i, 0)),
                pl.BlockSpec((Din, Fh), lambda i: (0, 0)),
                pl.BlockSpec((1, Fh), lambda i: (0, 0)),
                pl.BlockSpec((Fh, C_pad), lambda i: (0, 0)),
                pl.BlockSpec((1, C_pad), lambda i: (0, 0)),
            ],
            out_specs=pl.BlockSpec((TB, C_pad), lambda i: (i, 0)),
        ),
        compiler_params=pltpu.CompilerParams(dimension_semantics=("parallel",)),
    )(xp, w1t, b1r, w2p, b2p)
    return out[:B, :num_classes]


def classifier_forward(sent1, sent2, len1, len2, idx_unsort_1, idx_unsort_2,
                       h0_1, h0_2, emb_table, gru_params, head_params, *, num_classes):
    w1, b1, w2, b2 = head_params
    s1 = bigru_encode(sent1, len1, h0_1, emb_table, gru_params)
    s1 = jnp.take(s1, idx_unsort_1, axis=0)          # index_select(0, idx_unsort_1)
    s2 = bigru_encode(sent2, len2, h0_2, emb_table, gru_params)
    s2 = jnp.take(s2, idx_unsort_2, axis=0)
    combined = jnp.concatenate([s1, s2], axis=1)     # (B, 4H)
    return mlp_head(combined, w1, b1, w2, b2, num_classes=num_classes)


# ---------------------------------------------------------------------------
# 3) CNN encoder kernel (dependent class; unused by Classifier.forward, kept fused)
# ---------------------------------------------------------------------------
def _cnn_kernel(ids_ref, tbl_ref, w1_ref, b1_ref, w2_ref, b2_ref, o_ref, *, S, TB, V):
    """One grid step: TB packed sequences -> (TB, H) max-pooled features."""
    M = TB * (S + 1)          # packed rows: [seq0, sep, seq1, sep, ...]
    ids = ids_ref[...]        # (M + 4, 1) int32; -1 rows are pads/separators

    iota = jax.lax.broadcasted_iota(jnp.int32, (M + 4, V), 1)
    onehot = (ids == iota).astype(jnp.float32)
    x = jnp.dot(onehot, tbl_ref[...], preferred_element_type=jnp.float32)    # (M + 4, E)

    def fused_conv_relu(left, center, right, w_ref, b_ref):
        x3 = jnp.concatenate([left, center, right], axis=-1)                 # (rows, 3C)
        y = jnp.dot(x3, w_ref[...], preferred_element_type=jnp.float32) + b_ref[...]
        return jnp.maximum(y, 0.0)

    h1 = fused_conv_relu(x[0:M + 2, :], x[1:M + 3, :], x[2:M + 4, :], w1_ref, b1_ref)
    h1 = jnp.where(ids[1:M + 3, :] < 0, 0.0, h1)                             # zero pad rows
    h2 = fused_conv_relu(h1[0:M, :], h1[1:M + 1, :], h1[2:M + 2, :], w2_ref, b2_ref)

    pooled = [
        jnp.max(h2[t * (S + 1):t * (S + 1) + S, :], axis=0, keepdims=True)
        for t in range(TB)
    ]
    o_ref[...] = jnp.concatenate(pooled, axis=0)                             # dense (TB, H)


def cnn_forward(x_ids, lengths, emb_table, w1, b1, w2, b2, *, tile_batch=8):
    del lengths  # the reference CNN forward ignores lengths
    B, S = x_ids.shape
    V, E = emb_table.shape
    H = w1.shape[0]

    if B <= tile_batch:
        TB, num_tiles = B, 1
    else:
        TB = tile_batch
        assert TB % 8 == 0
        num_tiles = -(-B // TB)
    B_pad = num_tiles * TB
    M = TB * (S + 1)

    ids = jnp.full((B_pad, S + 1), -1, dtype=jnp.int32)
    ids = ids.at[:B, :S].set(x_ids.astype(jnp.int32))
    ids = ids.reshape(num_tiles, M)
    ids = jnp.pad(ids, ((0, 0), (2, 2)), constant_values=-1)[..., None]

    w1_3 = jnp.concatenate([w1[:, :, k].T for k in range(3)], axis=0).astype(jnp.float32)
    w2_3 = jnp.concatenate([w2[:, :, k].T for k in range(3)], axis=0).astype(jnp.float32)
    b1r = b1.reshape(1, H).astype(jnp.float32)
    b2r = b2.reshape(1, H).astype(jnp.float32)

    kernel = functools.partial(_cnn_kernel, S=S, TB=TB, V=V)
    out = pl.pallas_call(
        kernel,
        out_shape=jax.ShapeDtypeStruct((B_pad, H), jnp.float32),
        grid_spec=pltpu.PrefetchScalarGridSpec(
            num_scalar_prefetch=0,
            grid=(num_tiles,),
            in_specs=[
                pl.BlockSpec((pl.Squeezed(), M + 4, 1), lambda t: (t, 0, 0)),
                pl.BlockSpec((V, E), lambda t: (0, 0)),
                pl.BlockSpec((3 * E, H), lambda t: (0, 0)),
                pl.BlockSpec((1, H), lambda t: (0, 0)),
                pl.BlockSpec((3 * H, H), lambda t: (0, 0)),
                pl.BlockSpec((1, H), lambda t: (0, 0)),
            ],
            out_specs=pl.BlockSpec((TB, H), lambda t: (t, 0)),
        ),
        compiler_params=pltpu.CompilerParams(dimension_semantics=("parallel",)),
    )(ids, emb_table.astype(jnp.float32), w1_3, b1r, w2_3, b2r)
    return out[:B]


# ---------------------------------------------------------------------------
# Pure-JAX references (mirror the PyTorch forward)
# ---------------------------------------------------------------------------
_HP = jax.lax.Precision.HIGHEST


def _gru_cell_ref(x_t, h, w_ih, w_hh, b_ih, b_hh, H):
    gi = jnp.dot(x_t, w_ih.T, precision=_HP) + b_ih
    gh = jnp.dot(h, w_hh.T, precision=_HP) + b_hh
    r = jax.nn.sigmoid(gi[:, :H] + gh[:, :H])
    z = jax.nn.sigmoid(gi[:, H:2 * H] + gh[:, H:2 * H])
    n = jnp.tanh(gi[:, 2 * H:] + r * gh[:, 2 * H:])
    return (1.0 - z) * n + z * h


def bigru_reference(x_ids, lengths, h0, emb_table, gru_params):
    (w_ih_f, w_hh_f, b_ih_f, b_hh_f, w_ih_b, w_hh_b, b_ih_b, b_hh_b) = gru_params
    H = w_hh_f.shape[1]
    B, S = x_ids.shape
    x = emb_table[x_ids]
    h = h0[:, :H]
    for t in range(S):
        h_new = _gru_cell_ref(x[:, t], h, w_ih_f, w_hh_f, b_ih_f, b_hh_f, H)
        h = jnp.where((lengths > t)[:, None], h_new, h)
    h_f = h
    h = h0[:, H:]
    for t in range(S - 1, -1, -1):
        h_new = _gru_cell_ref(x[:, t], h, w_ih_b, w_hh_b, b_ih_b, b_hh_b, H)
        h = jnp.where((lengths > t)[:, None], h_new, h)
    h_b = h
    return jnp.concatenate([h_f, h_b], axis=-1)


def classifier_reference(sent1, sent2, len1, len2, idx_unsort_1, idx_unsort_2,
                         h0_1, h0_2, emb_table, gru_params, head_params):
    w1, b1, w2, b2 = head_params
    s1 = bigru_reference(sent1, len1, h0_1, emb_table, gru_params)[idx_unsort_1]
    s2 = bigru_reference(sent2, len2, h0_2, emb_table, gru_params)[idx_unsort_2]
    combined = jnp.concatenate([s1, s2], axis=1)
    hid = jax.nn.relu(jnp.dot(combined, w1.T, precision=_HP) + b1)
    return jnp.dot(hid, w2.T, precision=_HP) + b2


def cnn_reference(x_ids, emb_table, w1, b1, w2, b2):
    embed = emb_table[x_ids]                                   # (B, S, E)

    def conv1d(h, w, b):
        hp = jnp.pad(h, ((0, 0), (1, 1), (0, 0)))
        y = jnp.einsum('bski,oik->bso',
                       jnp.stack([hp[:, k:k + h.shape[1], :] for k in range(3)], axis=2),
                       w) + b
        return y

    h = jax.nn.relu(conv1d(embed, w1, b1))
    h = jax.nn.relu(conv1d(h, w2, b2))
    return jnp.max(h, axis=1)


if __name__ == "__main__":
    # Small shapes consistent with the module (real model: E = H = 300, fc_hidden = 1024).
    B, S = 8, 8
    V, E, H = 50, 32, 32
    Fh, C = 128, 3

    key = jax.random.PRNGKey(0)
    ks = jax.random.split(key, 16)

    def winit(k, shape):
        return 0.1 * jax.random.normal(k, shape, jnp.float32)

    emb_table = jax.random.normal(ks[0], (V, E), jnp.float32)
    gru_params = (
        winit(ks[1], (3 * H, E)), winit(ks[2], (3 * H, H)),
        winit(ks[3], (3 * H,)), winit(ks[4], (3 * H,)),
        winit(ks[5], (3 * H, E)), winit(ks[6], (3 * H, H)),
        winit(ks[7], (3 * H,)), winit(ks[8], (3 * H,)),
    )
    w1 = winit(ks[9], (Fh, 4 * H)); b1 = winit(ks[10], (Fh,))
    w2 = winit(ks[11], (C, Fh));    b2 = winit(ks[12], (C,))
    head_params = (w1, b1, w2, b2)

    sent1 = jax.random.randint(ks[13], (B, S), 0, V, jnp.int32)
    sent2 = jax.random.randint(ks[14], (B, S), 0, V, jnp.int32)
    k15, k16, k17, k18, k19, k20 = jax.random.split(ks[15], 6)
    len1 = jnp.sort(jax.random.randint(k15, (B,), 1, S + 1, jnp.int32))[::-1]
    len2 = jnp.sort(jax.random.randint(k16, (B,), 1, S + 1, jnp.int32))[::-1]
    idx_unsort_1 = jax.random.permutation(k17, B)
    idx_unsort_2 = jax.random.permutation(k18, B)
    # RNN.forward draws a fresh torch.randn h0 each call; deterministic draws passed in here.
    h0_1 = jax.random.normal(k19, (B, 2 * H), jnp.float32)
    h0_2 = jax.random.normal(k20, (B, 2 * H), jnp.float32)

    logits = classifier_forward(sent1, sent2, len1, len2, idx_unsort_1, idx_unsort_2,
                                h0_1, h0_2, emb_table, gru_params, head_params,
                                num_classes=C)
    logits = jax.block_until_ready(logits)
    ref = classifier_reference(sent1, sent2, len1, len2, idx_unsort_1, idx_unsort_2,
                               h0_1, h0_2, emb_table, gru_params, head_params)
    assert logits.shape == (B, C)
    assert jnp.allclose(logits, ref, atol=5e-4, rtol=5e-4), "classifier mismatch vs reference"

    # --- CNN encoder kernel check (dependent class) -----------------------------------
    cb, cs = 16, 16
    kc = jax.random.split(jax.random.PRNGKey(1), 3)
    cw1 = winit(kc[0], (H, E, 3)); cb1 = winit(kc[1], (H,))
    cw2 = winit(kc[2], (H, H, 3)); cb2 = winit(jax.random.PRNGKey(2), (H,))
    cx = jax.random.randint(jax.random.PRNGKey(3), (cb, cs), 0, V, jnp.int32)
    cout = cnn_forward(cx, jnp.full((cb,), cs, jnp.int32), emb_table,
                       cw1, cb1, cw2, cb2, tile_batch=8)
    cout = jax.block_until_ready(cout)
    cref = cnn_reference(cx, emb_table, cw1, cb1, cw2, cb2)
    assert cout.shape == (cb, H)
    assert jnp.allclose(cout, cref, atol=1e-4, rtol=1e-4), "CNN mismatch vs reference"

    print("KERNEL_OK")
</pallas_src>

<mosaic_0001>
module attributes {stable_mosaic.version = 11 : i64} {
  func.func @_bigru_kernel(%arg0: i32, %arg1: memref<1x64x1xi32, #tpu.memory_space<vmem>>, %arg2: memref<1x8x1xi32, #tpu.memory_space<vmem>>, %arg3: memref<8x64xf32, #tpu.memory_space<vmem>>, %arg4: memref<50x32xf32, #tpu.memory_space<vmem>>, %arg5: memref<32x192xf32, #tpu.memory_space<vmem>>, %arg6: memref<1x192xf32, #tpu.memory_space<vmem>>, %arg7: memref<32x96xf32, #tpu.memory_space<vmem>>, %arg8: memref<1x96xf32, #tpu.memory_space<vmem>>, %arg9: memref<32x96xf32, #tpu.memory_space<vmem>>, %arg10: memref<1x96xf32, #tpu.memory_space<vmem>>, %arg11: memref<8x64xf32, #tpu.memory_space<vmem>>, %arg12: memref<64x192xf32, #tpu.memory_space<vmem>>) attributes {dimension_semantics = [#tpu.dimension_semantics<parallel>], iteration_bounds = array<i64: 1>, scalar_prefetch = 0 : i64, scratch_operands = 1 : i64, tpu.core_type = #tpu.core_type<tc>, window_params = [{transform_indices = @transform_0, window_bounds = array<i64: 1, 64, 1>}, {transform_indices = @transform_1, window_bounds = array<i64: 1, 8, 1>}, {transform_indices = @transform_2, window_bounds = array<i64: 8, 64>}, {pipeline_mode = #tpu.pipeline_mode<synchronous>, transform_indices = @transform_3, window_bounds = array<i64: 50, 32>}, {pipeline_mode = #tpu.pipeline_mode<synchronous>, transform_indices = @transform_4, window_bounds = array<i64: 32, 192>}, {pipeline_mode = #tpu.pipeline_mode<synchronous>, transform_indices = @transform_5, window_bounds = array<i64: 1, 192>}, {pipeline_mode = #tpu.pipeline_mode<synchronous>, transform_indices = @transform_6, window_bounds = array<i64: 32, 96>}, {pipeline_mode = #tpu.pipeline_mode<synchronous>, transform_indices = @transform_7, window_bounds = array<i64: 1, 96>}, {pipeline_mode = #tpu.pipeline_mode<synchronous>, transform_indices = @transform_8, window_bounds = array<i64: 32, 96>}, {pipeline_mode = #tpu.pipeline_mode<synchronous>, transform_indices = @transform_9, window_bounds = array<i64: 1, 96>}, {transform_indices = @transform_10, window_bounds = array<i64: 8, 64>}]} {
    %c0 = arith.constant 0 : index
    %c0_0 = arith.constant 0 : index
    %c0_1 = arith.constant 0 : index
    %0 = vector.load %arg1[%c0, %c0_0, %c0_1] : memref<1x64x1xi32, #tpu.memory_space<vmem>>, vector<1x64x1xi32>
    %1 = vector.shape_cast %0 : vector<1x64x1xi32> to vector<64x1xi32>
    %2 = tpu.iota {dimensions = array<i32: 1>} : vector<64x50xi32>
    %3 = vector.broadcast %1 : vector<64x1xi32> to vector<64x50xi32>
    %4 = arith.cmpi eq, %3, %2 : vector<64x50xi32>
    %5 = arith.extui %4 : vector<64x50xi1> to vector<64x50xi32>
    %6 = arith.sitofp %5 : vector<64x50xi32> to vector<64x50xf32>
    %c0_2 = arith.constant 0 : index
    %c0_3 = arith.constant 0 : index
    %7 = vector.load %arg4[%c0_2, %c0_3] : memref<50x32xf32, #tpu.memory_space<vmem>>, vector<50x32xf32>
    %cst = arith.constant dense<0.000000e+00> : vector<64x32xf32>
    %8 = tpu.matmul %6, %7, %cst {dimension_numbers = #tpu.dot_dimension_numbers<[1], [0], [0], [1], [0, 0, 1, 1], [], []>} : vector<64x50xf32>, vector<50x32xf32>, vector<64x32xf32> -> vector<64x32xf32>
    %c0_4 = arith.constant 0 : index
    %c0_5 = arith.constant 0 : index
    %9 = vector.load %arg5[%c0_4, %c0_5] : memref<32x192xf32, #tpu.memory_space<vmem>>, vector<32x192xf32>
    %cst_6 = arith.constant dense<0.000000e+00> : vector<64x192xf32>
    %10 = tpu.matmul %8, %9, %cst_6 {dimension_numbers = #tpu.dot_dimension_numbers<[1], [0], [0], [1], [0, 0, 1, 1], [], []>} : vector<64x32xf32>, vector<32x192xf32>, vector<64x192xf32> -> vector<64x192xf32>
    %c0_7 = arith.constant 0 : index
    %c0_8 = arith.constant 0 : index
    %11 = vector.load %arg6[%c0_7, %c0_8] : memref<1x192xf32, #tpu.memory_space<vmem>>, vector<1x192xf32>
    %12 = vector.broadcast %11 : vector<1x192xf32> to vector<64x192xf32>
    %13 = arith.addf %10, %12 : vector<64x192xf32>
    %c0_9 = arith.constant 0 : index
    %c0_10 = arith.constant 0 : index
    %14 = vector.load %arg12[%c0_9, %c0_10] : memref<64x192xf32, #tpu.memory_space<vmem>>, vector<64x192xf32>
    tpu.vector_store %arg12[%c0_9, %c0_10], %13 {strides = array<i32>} : memref<64x192xf32, #tpu.memory_space<vmem>>, vector<64x192xf32>,
    %c0_11 = arith.constant 0 : index
    %c0_12 = arith.constant 0 : index
    %c0_13 = arith.constant 0 : index
    %15 = vector.load %arg2[%c0_11, %c0_12, %c0_13] : memref<1x8x1xi32, #tpu.memory_space<vmem>>, vector<1x8x1xi32>
    %16 = vector.shape_cast %15 : vector<1x8x1xi32> to vector<8x1xi32>
    %c0_14 = arith.constant 0 : index
    %c0_15 = arith.constant 0 : index
    %17 = vector.load %arg3[%c0_14, %c0_15] : memref<8x64xf32, #tpu.memory_space<vmem>>, vector<8x64xf32>
    %c0_16 = arith.constant 0 : index
    %c0_17 = arith.constant 0 : index
    %18 = vector.load %arg7[%c0_16, %c0_17] : memref<32x96xf32, #tpu.memory_space<vmem>>, vector<32x96xf32>
    %c0_18 = arith.constant 0 : index
    %c0_19 = arith.constant 0 : index
    %19 = vector.load %arg8[%c0_18, %c0_19] : memref<1x96xf32, #tpu.memory_space<vmem>>, vector<1x96xf32>
    %c0_20 = arith.constant 0 : index
    %c0_21 = arith.constant 0 : index
    %20 = vector.load %arg9[%c0_20, %c0_21] : memref<32x96xf32, #tpu.memory_space<vmem>>, vector<32x96xf32>
    %c0_22 = arith.constant 0 : index
    %c0_23 = arith.constant 0 : index
    %21 = vector.load %arg10[%c0_22, %c0_23] : memref<1x96xf32, #tpu.memory_space<vmem>>, vector<1x96xf32>
    %22 = vector.extract_strided_slice %17 {offsets = [0, 0], sizes = [8, 32], strides = [1, 1]} : vector<8x64xf32> to vector<8x32xf32>
    %c0_i32 = arith.constant 0 : i32
    %c8_i32 = arith.constant 8 : i32
    %23 = arith.addi %c0_i32, %c8_i32 : i32
    %c1_i32 = arith.constant 1 : i32
    %24 = scf.for %arg13 = %c0_i32 to %23 step %c1_i32 iter_args(%arg14 = %22) -> (vector<8x32xf32>)  : i32 {
      %c8_i32_31 = arith.constant 8 : i32
      %30 = arith.muli %arg13, %c8_i32_31 : i32
      %31 = tpu.assume_multiple %30, 8 : i32
      %32 = arith.index_cast %31 : i32 to index
      %c0_32 = arith.constant 0 : index
      %33 = vector.load %arg12[%32, %c0_32] : memref<64x192xf32, #tpu.memory_space<vmem>>, vector<8x192xf32>
      %34 = vector.extract_strided_slice %33 {offsets = [0, 0], sizes = [8, 96], strides = [1, 1]} : vector<8x192xf32> to vector<8x96xf32>
      %cst_33 = arith.constant dense<0.000000e+00> : vector<8x96xf32>
      %35 = tpu.matmul %arg14, %18, %cst_33 {dimension_numbers = #tpu.dot_dimension_numbers<[1], [0], [0], [1], [0, 0, 1, 1], [], []>} : vector<8x32xf32>, vector<32x96xf32>, vector<8x96xf32> -> vector<8x96xf32>
      %36 = vector.broadcast %19 : vector<1x96xf32> to vector<8x96xf32>
      %37 = arith.addf %35, %36 : vector<8x96xf32>
      %38 = vector.extract_strided_slice %34 {offsets = [0, 0], sizes = [8, 32], strides = [1, 1]} : vector<8x96xf32> to vector<8x32xf32>
      %39 = vector.extract_strided_slice %37 {offsets = [0, 0], sizes = [8, 32], strides = [1, 1]} : vector<8x96xf32> to vector<8x32xf32>
      %40 = arith.addf %38, %39 : vector<8x32xf32>
      %41 = arith.negf %40 : vector<8x32xf32>
      %42 = math.exp %41 : vector<8x32xf32>
      %cst_34 = arith.constant 1.000000e+00 : f32
      %43 = vector.broadcast %cst_34 : f32 to vector<8x32xf32>
      %44 = arith.addf %43, %42 : vector<8x32xf32>
      %45 = arith.divf %43, %44 : vector<8x32xf32>
      %46 = vector.extract_strided_slice %34 {offsets = [0, 32], sizes = [8, 32], strides = [1, 1]} : vector<8x96xf32> to vector<8x32xf32>
      %47 = vector.extract_strided_slice %37 {offsets = [0, 32], sizes = [8, 32], strides = [1, 1]} : vector<8x96xf32> to vector<8x32xf32>
      %48 = arith.addf %46, %47 : vector<8x32xf32>
      %49 = arith.negf %48 : vector<8x32xf32>
      %50 = math.exp %49 : vector<8x32xf32>
      %cst_35 = arith.constant 1.000000e+00 : f32
      %51 = vector.broadcast %cst_35 : f32 to vector<8x32xf32>
      %52 = arith.addf %51, %50 : vector<8x32xf32>
      %53 = arith.divf %51, %52 : vector<8x32xf32>
      %54 = vector.extract_strided_slice %34 {offsets = [0, 64], sizes = [8, 32], strides = [1, 1]} : vector<8x96xf32> to vector<8x32xf32>
      %55 = vector.extract_strided_slice %37 {offsets = [0, 64], sizes = [8, 32], strides = [1, 1]} : vector<8x96xf32> to vector<8x32xf32>
      %56 = arith.mulf %45, %55 : vector<8x32xf32>
      %57 = arith.addf %54, %56 : vector<8x32xf32>
      %58 = math.tanh %57 : vector<8x32xf32>
      %cst_36 = arith.constant 1.000000e+00 : f32
      %59 = vector.broadcast %cst_36 : f32 to vector<8x32xf32>
      %60 = arith.subf %59, %53 : vector<8x32xf32>
      %61 = arith.mulf %60, %58 : vector<8x32xf32>
      %62 = arith.mulf %53, %arg14 : vector<8x32xf32>
      %63 = arith.addf %61, %62 : vector<8x32xf32>
      %64 = vector.broadcast %arg13 : i32 to vector<8x1xi32>
      %65 = arith.cmpi sgt, %16, %64 : vector<8x1xi32>
      %66 = vector.shape_cast %65 : vector<8x1xi1> to vector<8x1xi1>
      %67 = vector.broadcast %66 : vector<8x1xi1> to vector<8x32xi1>
      %68 = arith.select %67, %63, %arg14 : vector<8x32xi1>, vector<8x32xf32>
      scf.yield %68 : vector<8x32xf32>
    }
    %c8_i32_24 = arith.constant 8 : i32
    %25 = vector.extract_strided_slice %17 {offsets = [0, 32], sizes = [8, 32], strides = [1, 1]} : vector<8x64xf32> to vector<8x32xf32>
    %c0_i32_25 = arith.constant 0 : i32
    %c8_i32_26 = arith.constant 8 : i32
    %26 = arith.addi %c0_i32_25, %c8_i32_26 : i32
    %c1_i32_27 = arith.constant 1 : i32
    %27 = scf.for %arg13 = %c0_i32_25 to %26 step %c1_i32_27 iter_args(%arg14 = %25) -> (vector<8x32xf32>)  : i32 {
      %c7_i32 = arith.constant 7 : i32
      %30 = arith.subi %c7_i32, %arg13 : i32
      %c8_i32_31 = arith.constant 8 : i32
      %31 = arith.muli %30, %c8_i32_31 : i32
      %32 = tpu.assume_multiple %31, 8 : i32
      %33 = arith.index_cast %32 : i32 to index
      %c0_32 = arith.constant 0 : index
      %34 = vector.load %arg12[%33, %c0_32] : memref<64x192xf32, #tpu.memory_space<vmem>>, vector<8x192xf32>
      %35 = vector.extract_strided_slice %34 {offsets = [0, 96], sizes = [8, 96], strides = [1, 1]} : vector<8x192xf32> to vector<8x96xf32>
      %cst_33 = arith.constant dense<0.000000e+00> : vector<8x96xf32>
      %36 = tpu.matmul %arg14, %20, %cst_33 {dimension_numbers = #tpu.dot_dimension_numbers<[1], [0], [0], [1], [0, 0, 1, 1], [], []>} : vector<8x32xf32>, vector<32x96xf32>, vector<8x96xf32> -> vector<8x96xf32>
      %37 = vector.broadcast %21 : vector<1x96xf32> to vector<8x96xf32>
      %38 = arith.addf %36, %37 : vector<8x96xf32>
      %39 = vector.extract_strided_slice %35 {offsets = [0, 0], sizes = [8, 32], strides = [1, 1]} : vector<8x96xf32> to vector<8x32xf32>
      %40 = vector.extract_strided_slice %38 {offsets = [0, 0], sizes = [8, 32], strides = [1, 1]} : vector<8x96xf32> to vector<8x32xf32>
      %41 = arith.addf %39, %40 : vector<8x32xf32>
      %42 = arith.negf %41 : vector<8x32xf32>
      %43 = math.exp %42 : vector<8x32xf32>
      %cst_34 = arith.constant 1.000000e+00 : f32
      %44 = vector.broadcast %cst_34 : f32 to vector<8x32xf32>
      %45 = arith.addf %44, %43 : vector<8x32xf32>
      %46 = arith.divf %44, %45 : vector<8x32xf32>
      %47 = vector.extract_strided_slice %35 {offsets = [0, 32], sizes = [8, 32], strides = [1, 1]} : vector<8x96xf32> to vector<8x32xf32>
      %48 = vector.extract_strided_slice %38 {offsets = [0, 32], sizes = [8, 32], strides = [1, 1]} : vector<8x96xf32> to vector<8x32xf32>
      %49 = arith.addf %47, %48 : vector<8x32xf32>
      %50 = arith.negf %49 : vector<8x32xf32>
      %51 = math.exp %50 : vector<8x32xf32>
      %cst_35 = arith.constant 1.000000e+00 : f32
      %52 = vector.broadcast %cst_35 : f32 to vector<8x32xf32>
      %53 = arith.addf %52, %51 : vector<8x32xf32>
      %54 = arith.divf %52, %53 : vector<8x32xf32>
      %55 = vector.extract_strided_slice %35 {offsets = [0, 64], sizes = [8, 32], strides = [1, 1]} : vector<8x96xf32> to vector<8x32xf32>
      %56 = vector.extract_strided_slice %38 {offsets = [0, 64], sizes = [8, 32], strides = [1, 1]} : vector<8x96xf32> to vector<8x32xf32>
      %57 = arith.mulf %46, %56 : vector<8x32xf32>
      %58 = arith.addf %55, %57 : vector<8x32xf32>
      %59 = math.tanh %58 : vector<8x32xf32>
      %cst_36 = arith.constant 1.000000e+00 : f32
      %60 = vector.broadcast %cst_36 : f32 to vector<8x32xf32>
      %61 = arith.subf %60, %54 : vector<8x32xf32>
      %62 = arith.mulf %61, %59 : vector<8x32xf32>
      %63 = arith.mulf %54, %arg14 : vector<8x32xf32>
      %64 = arith.addf %62, %63 : vector<8x32xf32>
      %65 = vector.broadcast %30 : i32 to vector<8x1xi32>
      %66 = arith.cmpi sgt, %16, %65 : vector<8x1xi32>
      %67 = vector.shape_cast %66 : vector<8x1xi1> to vector<8x1xi1>
      %68 = vector.broadcast %67 : vector<8x1xi1> to vector<8x32xi1>
      %69 = arith.select %68, %64, %arg14 : vector<8x32xi1>, vector<8x32xf32>
      scf.yield %69 : vector<8x32xf32>
    }
    %c8_i32_28 = arith.constant 8 : i32
    %28 = tpu.concatenate %24, %27 in 1 : vector<8x32xf32>, vector<8x32xf32> -> vector<8x64xf32>
    %c0_29 = arith.constant 0 : index
    %c0_30 = arith.constant 0 : index
    %29 = vector.load %arg11[%c0_29, %c0_30] : memref<8x64xf32, #tpu.memory_space<vmem>>, vector<8x64xf32>
    tpu.vector_store %arg11[%c0_29, %c0_30], %28 {strides = array<i32>} : memref<8x64xf32, #tpu.memory_space<vmem>>, vector<8x64xf32>,
    return
  }
  func.func @transform_0(%arg0: i32) -> (i32, i32, i32) {
    %c0_i32 = arith.constant 0 : i32
    %c0_i32_0 = arith.constant 0 : i32
    %c0_i32_1 = arith.constant 0 : i32
    return %arg0, %c0_i32, %c0_i32_0 : i32, i32, i32
  }
  func.func @transform_1(%arg0: i32) -> (i32, i32, i32) {
    %c0_i32 = arith.constant 0 : i32
    %c0_i32_0 = arith.constant 0 : i32
    %c0_i32_1 = arith.constant 0 : i32
    return %arg0, %c0_i32, %c0_i32_0 : i32, i32, i32
  }
  func.func @transform_2(%arg0: i32) -> (i32, i32) {
    %c0_i32 = arith.constant 0 : i32
    %c0_i32_0 = arith.constant 0 : i32
    return %arg0, %c0_i32 : i32, i32
  }
  func.func @transform_3(%arg0: i32) -> (i32, i32) {
    %c0_i32 = arith.constant 0 : i32
    %c0_i32_0 = arith.constant 0 : i32
    %c0_i32_1 = arith.constant 0 : i32
    return %c0_i32, %c0_i32_0 : i32, i32
  }
  func.func @transform_4(%arg0: i32) -> (i32, i32) {
    %c0_i32 = arith.constant 0 : i32
    %c0_i32_0 = arith.constant 0 : i32
    %c0_i32_1 = arith.constant 0 : i32
    return %c0_i32, %c0_i32_0 : i32, i32
  }
  func.func @transform_5(%arg0: i32) -> (i32, i32) {
    %c0_i32 = arith.constant 0 : i32
    %c0_i32_0 = arith.constant 0 : i32
    %c0_i32_1 = arith.constant 0 : i32
    return %c0_i32, %c0_i32_0 : i32, i32
  }
  func.func @transform_6(%arg0: i32) -> (i32, i32) {
    %c0_i32 = arith.constant 0 : i32
    %c0_i32_0 = arith.constant 0 : i32
    %c0_i32_1 = arith.constant 0 : i32
    return %c0_i32, %c0_i32_0 : i32, i32
  }
  func.func @transform_7(%arg0: i32) -> (i32, i32) {
    %c0_i32 = arith.constant 0 : i32
    %c0_i32_0 = arith.constant 0 : i32
    %c0_i32_1 = arith.constant 0 : i32
    return %c0_i32, %c0_i32_0 : i32, i32
  }
  func.func @transform_8(%arg0: i32) -> (i32, i32) {
    %c0_i32 = arith.constant 0 : i32
    %c0_i32_0 = arith.constant 0 : i32
    %c0_i32_1 = arith.constant 0 : i32
    return %c0_i32, %c0_i32_0 : i32, i32
  }
  func.func @transform_9(%arg0: i32) -> (i32, i32) {
    %c0_i32 = arith.constant 0 : i32
    %c0_i32_0 = arith.constant 0 : i32
    %c0_i32_1 = arith.constant 0 : i32
    return %c0_i32, %c0_i32_0 : i32, i32
  }
  func.func @transform_10(%arg0: i32) -> (i32, i32) {
    %c0_i32 = arith.constant 0 : i32
    %c0_i32_0 = arith.constant 0 : i32
    return %arg0, %c0_i32 : i32, i32
  }
}

</mosaic_0001>

<bundles_post_ra>
// kernel: tpu_custom_call.1
= control target key start
LH: loop header
LB: loop body
LE: loop exit
PB: predicated region body
PF: predicated region fallthrough
CT: control target
= control target key end

     0   :  { %v985_v2 = vmov 0   ;;  %vm126_vm0 = vcmask 1041408   ;;  %s1292_s0 = inlined_call_operand.vmem [shape: s32[1,64,1], index: 0, kind: input, shape index: {}]   ;;  %s1293_s1 = inlined_call_operand.vmem [shape: s32[1,8,1], index: 1, kind: input, shape index: {}]   ;;  %s1294_s2 = inlined_call_operand.vmem [shape: f32[8,64], index: 2, kind: input, shape index: {}]   ;;  %s1295_s3 = inlined_call_operand.vmem [shape: f32[50,32], index: 3, kind: input, shape index: {}]   ;;  %s1296_s4 = inlined_call_operand.vmem [shape: f32[32,192], index: 4, kind: input, shape index: {}]   ;;  %s1297_s5 = inlined_call_operand.vmem [shape: f32[1,192], index: 5, kind: input, shape index: {}]   ;;  %s1298_s6 = inlined_call_operand.vmem [shape: f32[32,96], index: 6, kind: input, shape index: {}]   ;;  %s1299_s7 = inlined_call_operand.vmem [shape: f32[1,96], index: 7, kind: input, shape index: {}]   ;;  %s1300_s8 = inlined_call_operand.vmem [shape: f32[32,96], index: 8, kind: input, shape index: {}]   ;;  %s1301_s9 = inlined_call_operand.vmem [shape: f32[1,96], index: 9, kind: input, shape index: {}]   ;;  %s1302_s10 = inlined_call_operand.hbm [shape: f32[8,64], index: 10, kind: output, shape index: {}]  }
   0x1   :  { %v38_v0 = vld [vmem:[%s1292_s0 + $0x10] sm:$0xff]  ;;  %v36_v1 = vld [vmem:[%s1292_s0] sm:$0xff]  ;;  %910 = vset.pattern.permute.xlu1 %v985_v2  ;;  %909 = vset.pattern.permute.xlu0 %v985_v2 }
   0x2   :  { %53 = vperm.xlu1 %910, %v38_v0   ;;  %47 = vperm.xlu0 %909, %v36_v1  }
   0x3   :  { %15 = vsyncpa [#allocation4], 0  ;;  %v39_v3 = vld [vmem:[%s1292_s0 + $0x18] sm:$0xff]  ;;  %v37_v4 = vld [vmem:[%s1292_s0 + $0x8] sm:$0xff]  ;;  %v986_v6 = vmov 0.0   ;;  %v44_v24 = vlaneseq  ;;  %vm101_vm1 = vcmask 408576  }
   0x4   :  { %v100_v5 = vld [vmem:[%s1295_s3 + $0x30] sm:$0x3]  ;;  %350 = vmatprep.mubr.f32.mxu1 %v986_v6  ;;  %v99_v7 = vld [vmem:[%s1295_s3 + $0x28] sm:$0xff]  ;;  %v98_v8 = vld [vmem:[%s1295_s3 + $0x20] sm:$0xff]  ;;  %vm255_vm10 = vcmask 261120   ;;  %vm394_vm11 = vcmask 523264  }
   0x5   :  { %804 = vmatprep.subr.msk.mxu0 %vm126_vm0, %v100_v5  ;;  %v41_v9 = vld [vmem:[%s1292_s0 + $0x28] sm:$0xff]  ;;  %v40_v10 = vld [vmem:[%s1292_s0 + $0x20] sm:$0xff]  ;;  %v97_v11 = vld [vmem:[%s1295_s3 + $0x18] sm:$0xff]  ;;  %v45_v25 = vand.u32 127, %v44_v24  ;;  %v246_v63 = vshrl.u32 %v44_v24, 7 }
   0x6   :  { %805 = vmatpush3.msk.msra.mxu0 %vm126_vm0, %v100_v5  ;;  %56 = vperm.xlu1 %910, %v39_v3   ;;  %v43_v12 = vld [vmem:[%s1292_s0 + $0x38] sm:$0xff]  ;;  %v42_v13 = vld [vmem:[%s1292_s0 + $0x30] sm:$0xff]  ;;  %v95_v15 = vld [vmem:[%s1295_s3 + $0x8] sm:$0xff] }
   0x7   :  { %50 = vperm.xlu0 %909, %v37_v4   ;;  %806 = vmatprep.subr.mxu0 %v99_v7  ;;  %v96_v14 = vld [vmem:[%s1295_s3 + $0x10] sm:$0xff]  ;;  %v94_v16 = vld [vmem:[%s1295_s3] sm:$0xff]  ;;  %v242_v17 = vld [vmem:[%s1296_s4 + $0x38] sm:$0xff]  ;;  %v247_v0 = vsub.s32 0, %v246_v63  ;;  %v251_v2 = vsub.s32 1, %v246_v63 }
   0x8   :  { %807 = vmatpush3.msra.mxu0 %v99_v7  ;;  %v241_v18 = vld [vmem:[%s1296_s4 + $0x30] sm:$0xff]  ;;  %v240_v19 = vld [vmem:[%s1296_s4 + $0x28] sm:$0xff]  ;;  %852 = vmatprep.subr.mxu1 %v242_v17  ;;  %v239_v20 = vld [vmem:[%s1296_s4 + $0x20] sm:$0xff] }
   0x9   :  { %808 = vmatprep.subr.mxu0 %v98_v8  ;;  %856 = vmatpush1.msra.mxu1 %v241_v18  ;;  %v238_v21 = vld [vmem:[%s1296_s4 + $0x18] sm:$0xff]  ;;  %v237_v22 = vld [vmem:[%s1296_s4 + $0x10] sm:$0xff]  ;;  %v236_v23 = vld [vmem:[%s1296_s4 + $0x8] sm:$0xff] }
   0xa   :  { %62 = vperm.xlu1 %910, %v41_v9   ;;  %809 = vmatpush3.msra.mxu0 %v98_v8  ;;  %v235_v42 = vld [vmem:[%s1296_s4] sm:$0xff]  ;;  %v1177_v54 = vld [vmem:[%s1298_s6 + $0x8] sm:$0xff]  ;;  %v1182_v55 = vld [vmem:[%s1298_s6 + $0x10] sm:$0xff] }
   0xb   :  { %59 = vperm.xlu0 %909, %v40_v10   ;;  %810 = vmatprep.subr.mxu0 %v97_v11  ;;  %v1162_v51 = vld [vmem:[%s1293_s1] sm:$0xff]  ;;  %v1187_v56 = vld [vmem:[%s1298_s6 + $0x18] sm:$0xff]  ;;  %v1202_v59 = vld [vmem:[%s1300_s8 + $0x8] sm:$0xff] }
   0xc   :  { %811 = vmatpush3.msra.mxu0 %v97_v11  ;;  %853 = vmatprep.subr.mxu1 %v240_v19  ;;  %v1167_v52 = vld [vmem:[%s1294_s2] sm:$0xff]   ;;  %v1207_v60 = vld [vmem:[%s1300_s8 + $0x10] sm:$0xff]  ;;  %v1212_v61 = vld [vmem:[%s1300_s8 + $0x18] sm:$0xff] }
   0xd   :  { %812 = vmatprep.subr.mxu0 %v96_v14  ;;  %857 = vmatpush1.msra.mxu1 %v239_v20  ;;  %v1172_v53 = vld [vmem:[%s1298_s6] sm:$0xff] }
   0xe   :  { %68 = vperm.xlu1 %910, %v43_v12   ;;  %813 = vmatpush3.msra.mxu0 %v96_v14  ;;  %v1192_v57 = vld [vmem:[%s1299_s7] ss:$0 sm:$0xff] }
   0xf   :  { %65 = vperm.xlu0 %909, %v42_v13   ;;  %814 = vmatprep.subr.mxu0 %v95_v15  ;;  %v1197_v58 = vld [vmem:[%s1300_s8] sm:$0xff] }
  0x10   :  { %815 = vmatpush3.msra.mxu0 %v95_v15  ;;  %854 = vmatprep.subr.mxu1 %v238_v21  ;;  %v1217_v62 = vld [vmem:[%s1301_s9] ss:$0 sm:$0xff] }
  0x11   :  { %816 = vmatprep.subr.mxu0 %v94_v16  ;;  %858 = vmatpush1.msra.mxu1 %v237_v22  ;;  %v243_v1 = vld [vmem:[%s1297_s5] sm:$0x3]  ;;  %s1234_s5 = smov 0  }
  0x12   :  { %817 = vmatpush3.msra.mxu0 %v94_v16  ;;  %855 = vmatprep.subr.mxu1 %v236_v23  ;;  %v248_v3 = vrot.slane %v243_v1, %v247_v0  ;;  %v252_v4 = vrot.slane %v243_v1, %v251_v2 }
  0x13   :  { %304 = vmatprep.subr.mxu0 %v242_v17  ;;  %859 = vmatpush1.msra.mxu1 %v235_v42 }
  0x7d   :  { %v54_v26 = vpop.permute.xlu1 %53  ;;  %v48_v27 = vpop.permute.xlu0 %47 }
  0x7e   :  { %vm70_vm2 = vcmp.eq.s32.totalorder %v48_v27, %v45_v25  ;;  %vm72_vm3 = vcmp.eq.s32.totalorder %v54_v26, %v45_v25 }
  0x7f   :  { %v739_v28 = vsel %vm70_vm2, 1.0, %v986_v6  ;;  %v741_v31 = vsel %vm72_vm3, 1.0, %v986_v6 }
  0x80   :  { %818 = vmatprep.mubr.msk.f32.mxu0 %vm101_vm1, %v739_v28 }
  0x81   :  { %v57_v29 = vpop.permute.xlu1 %56 }
  0x82   :  { %v51_v30 = vpop.permute.xlu0 %50  ;;  %vm73_vm5 = vcmp.eq.s32.totalorder %v57_v29, %v45_v25 }
  0x83   :  { %vm71_vm4 = vcmp.eq.s32.totalorder %v51_v30, %v45_v25  ;;  %v742_v35 = vsel %vm73_vm5, 1.0, %v986_v6 }
  0x84   :  { %v740_v32 = vsel %vm71_vm4, 1.0, %v986_v6 }
  0x85   :  { %819 = vmatmul.mubr.msk.f32.vlgmr.msra.gmra.mxu0 %vm101_vm1, %v740_v32  ;;  %v63_v33 = vpop.permute.xlu1 %62 }
  0x86   :  { %821 = vmatprep.mubr.msk.f32.mxu0 %vm101_vm1, %v741_v31  ;;  %v60_v34 = vpop.permute.xlu0 %59  ;;  %305 = vmatpush1.msra.mxu0 %v241_v18  ;;  %vm75_vm7 = vcmp.eq.s32.totalorder %v63_v33, %v45_v25 }
  0x87   :  { %vm74_vm6 = vcmp.eq.s32.totalorder %v60_v34, %v45_v25  ;;  %306 = vmatprep.subr.mxu0 %v240_v19  ;;  %v744_v39 = vsel %vm75_vm7, 1.0, %v986_v6 }
  0x88   :  { %v743_v36 = vsel %vm74_vm6, 1.0, %v986_v6  ;;  %307 = vmatpush1.msra.mxu0 %v239_v20 }
  0x89   :  { %822 = vmatmul.mubr.msk.f32.gmra.mxu0 %vm101_vm1, %v742_v35  ;;  %308 = vmatprep.subr.mxu0 %v238_v21  ;;  %v69_v37 = vpop.permute.xlu1 %68 }
  0x8a   :  { %824 = vmatprep.mubr.msk.f32.mxu0 %vm101_vm1, %v743_v36  ;;  %v66_v38 = vpop.permute.xlu0 %65  ;;  %309 = vmatpush1.msra.mxu0 %v237_v22  ;;  %vm77_vm9 = vcmp.eq.s32.totalorder %v69_v37, %v45_v25  ;;  %v1303_v37 = vmov %v1167_v52 }
  0x8b   :  { %vm76_vm8 = vcmp.eq.s32.totalorder %v66_v38, %v45_v25  ;;  %310 = vmatprep.subr.mxu0 %v236_v23  ;;  %v746_v41 = vsel %vm77_vm9, 1.0, %v986_v6 }
  0x8c   :  { %v745_v40 = vsel %vm76_vm8, 1.0, %v986_v6  ;;  %311 = vmatpush1.msra.mxu0 %v235_v42 }
  0x8d   :  { %825 = vmatmul.mubr.msk.f32.gmra.mxu0 %vm101_vm1, %v744_v39 }
  0x8e   :  { %827 = vmatprep.mubr.msk.f32.mxu0 %vm101_vm1, %v745_v40 }
  0x91   :  { %828 = vmatmul.mubr.msk.f32.gmra.mxu0 %vm101_vm1, %v746_v41 }
  0x92   :  { %344 = vmatprep.mubr.f32.mxu0 %v986_v6 }
 0x145   :  { %v820_v43 = vpop.f32.mrf.mxu0 }
 0x146   :  { %757 = vmatmul.mubr.msk.f32.vlgmr.msra.gmra.mxu1 %vm255_vm10, %v820_v43 }
 0x147   :  { %v196_v44 = vpop.f32.mrf.mxu0  ;;  %356 = vmatprep.mubr.f32.mxu1 %v986_v6 }
 0x148   :  { %756 = vmatmul.mubr.msk.f32.vlgmr.msra.gmra.mxu0 %vm255_vm10, %v196_v44 }
 0x149   :  { %v823_v45 = vpop.f32.mrf.mxu0 }
 0x14b   :  { %v206_v46 = vpop.f32.mrf.mxu0 }
 0x14c   :  { %758 = vmatmul.mubr.msk.f32.gmra.mxu1 %vm255_vm10, %v206_v46 }
 0x14d   :  { %362 = vmatprep.mubr.f32.mxu1 %v986_v6  ;;  %v826_v47 = vpop.f32.mrf.mxu0 }
 0x14f   :  { %v216_v48 = vpop.f32.mrf.mxu0 }
 0x150   :  { %759 = vmatmul.mubr.msk.f32.gmra.mxu1 %vm255_vm10, %v823_v45 }
 0x151   :  { %368 = vmatprep.mubr.f32.mxu1 %v986_v6  ;;  %v829_v49 = vpop.f32.mrf.mxu0 }
 0x153   :  { %v226_v50 = vpop.f32.mrf.mxu0 }
 0x154   :  { %760 = vmatmul.mubr.msk.f32.gmra.mxu1 %vm255_vm10, %v216_v48 }
 0x155   :  { %374 = vmatprep.mubr.f32.mxu1 %v986_v6 }
 0x158   :  { %761 = vmatmul.mubr.msk.f32.gmra.mxu1 %vm255_vm10, %v826_v47 }
 0x159   :  { %380 = vmatprep.mubr.f32.mxu1 %v986_v6 }
 0x15c   :  { %762 = vmatmul.mubr.msk.f32.gmra.mxu1 %vm255_vm10, %v226_v50 }
 0x15d   :  { %386 = vmatprep.mubr.f32.mxu1 %v986_v6 }
 0x160   :  { %763 = vmatmul.mubr.msk.f32.gmra.mxu1 %vm255_vm10, %v829_v49 }
 0x206   :  { %v352_v5 = vpop.f32.mrf.mxu1 }
 0x207   :  { %v353_v6 = vadd.f32 %v352_v5, %v248_v3 }
 0x208   :  { %v346_v7 = vpop.f32.mrf.mxu0  ;;  %v354_v8 = vpop.f32.mrf.mxu1 }
 0x209   :  { %396 = vst [vmem:[#allocation2 + $0x10] sm:$0xff] %v353_v6  ;;  %v347_v9 = vadd.f32 %v346_v7, %v248_v3  ;;  %v355_v10 = vadd.f32 %v354_v8, %v252_v4 }
 0x20a   :  { %v348_v11 = vpop.f32.mrf.mxu0 }
 0x20b   :  { %393 = vst [vmem:[#allocation2] sm:$0xff] %v347_v9  ;;  %397 = vst.msk [vmem:[#allocation2 + $0x18] sm:$0xff] %vm394_vm11, %v355_v10  ;;  %v349_v12 = vadd.f32 %v348_v11, %v252_v4 }
 0x20c   :  { %v358_v13 = vpop.f32.mrf.mxu1 }
 0x20d   :  { %395 = vst.msk [vmem:[#allocation2 + $0x8] sm:$0xff] %vm394_vm11, %v349_v12  ;;  %v359_v14 = vadd.f32 %v358_v13, %v248_v3 }
 0x20e   :  { %v360_v15 = vpop.f32.mrf.mxu1 }
 0x20f   :  { %398 = vst [vmem:[#allocation2 + $0x20] sm:$0xff] %v359_v14  ;;  %v361_v16 = vadd.f32 %v360_v15, %v252_v4 }
 0x210   :  { %v364_v17 = vpop.f32.mrf.mxu1 }
 0x211   :  { %399 = vst.msk [vmem:[#allocation2 + $0x28] sm:$0xff] %vm394_vm11, %v361_v16  ;;  %v365_v18 = vadd.f32 %v364_v17, %v248_v3 }
 0x212   :  { %v366_v19 = vpop.f32.mrf.mxu1 }
 0x213   :  { %400 = vst [vmem:[#allocation2 + $0x30] sm:$0xff] %v365_v18  ;;  %v367_v20 = vadd.f32 %v366_v19, %v252_v4 }
 0x214   :  { %v370_v21 = vpop.f32.mrf.mxu1 }
 0x215   :  { %401 = vst.msk [vmem:[#allocation2 + $0x38] sm:$0xff] %vm394_vm11, %v367_v20  ;;  %v371_v22 = vadd.f32 %v370_v21, %v248_v3 }
 0x216   :  { %v372_v23 = vpop.f32.mrf.mxu1 }
 0x217   :  { %402 = vst [vmem:[#allocation2 + $0x40] sm:$0xff] %v371_v22  ;;  %v373_v24 = vadd.f32 %v372_v23, %v252_v4 }
 0x218   :  { %v376_v25 = vpop.f32.mrf.mxu1 }
 0x219   :  { %403 = vst.msk [vmem:[#allocation2 + $0x48] sm:$0xff] %vm394_vm11, %v373_v24  ;;  %v377_v26 = vadd.f32 %v376_v25, %v248_v3 }
 0x21a   :  { %v378_v27 = vpop.f32.mrf.mxu1 }
 0x21b   :  { %404 = vst [vmem:[#allocation2 + $0x50] sm:$0xff] %v377_v26  ;;  %v379_v28 = vadd.f32 %v378_v27, %v252_v4 }
 0x21c   :  { %v382_v29 = vpop.f32.mrf.mxu1 }
 0x21d   :  { %405 = vst.msk [vmem:[#allocation2 + $0x58] sm:$0xff] %vm394_vm11, %v379_v28  ;;  %v383_v30 = vadd.f32 %v382_v29, %v248_v3 }
 0x21e   :  { %v384_v31 = vpop.f32.mrf.mxu1 }
 0x21f   :  { %406 = vst [vmem:[#allocation2 + $0x60] sm:$0xff] %v383_v30  ;;  %v385_v32 = vadd.f32 %v384_v31, %v252_v4 }
 0x220   :  { %v388_v33 = vpop.f32.mrf.mxu1 }
 0x221   :  { %407 = vst.msk [vmem:[#allocation2 + $0x68] sm:$0xff] %vm394_vm11, %v385_v32  ;;  %v389_v34 = vadd.f32 %v388_v33, %v248_v3 }
 0x222   :  { %v390_v35 = vpop.f32.mrf.mxu1 }
 0x223   :  { %408 = vst [vmem:[#allocation2 + $0x70] sm:$0xff] %v389_v34  ;;  %v391_v36 = vadd.f32 %v390_v35, %v252_v4 }
 0x225   :  { %409 = vst.msk [vmem:[#allocation2 + $0x78] sm:$0xff] %vm394_vm11, %v391_v36 }
 0x226 LB: > { %v987_v38 = vmov 0.0   ;;  %vm988_vm12 = vmmov 0   ;;  %s989_s8 = smov 64   ;;  %s764_s9 = sshll.u32 %s975_s5, 3  ;;  %v544_v47 = vstv %s975_s5  ;;  %v990_v48 = vmov 0   ;;  %s975_s5 = sphi %s1234_s5, %s427_s5   ;;  %v971_v37 = vphi %v1303_v37, %v1305_v37  }
 0x227   : > { %830 = vmatprep.subr.mxu0 %v987_v38  ;;  %838 = vmatprep.mubr.msk.f32.mxu0 %vm988_vm12, %v987_v38  ;;  %s430_s16 = sshra.s32 %s764_s9, 3  ;;  %vm545_vm13 = vcmp.gt.s32.totalorder %v1162_v51, %v544_v47  ;;  %s991_s18 = smov 32  }
 0x228   : > { %831 = vmatpush3.msra.mxu0 %v1187_v56  ;;  %s777_s4 = sshll.u32 %s430_s16, 4  ;;  %911 = vset.pattern.permute.xlu1 %v990_v48  ;;  %v546_v49 = vsel %vm545_vm13, 1, %v990_v48  ;;  %s992_s19 = smov 96  }
 0x229   : > { %832 = vmatprep.subr.mxu0 %v987_v38  ;;  %s434_s17 = scalar_lea.vmem [#allocation2], %s777_s4  ;;  %912 = vset.pattern.permute.xlu0 %v990_v48  ;;  %s427_s5 = sadd.s32 1, %s975_s5  }
 0x22a   : > { %833 = vmatpush3.msra.mxu0 %v1182_v55  ;;  %548 = vperm.xlu1 %911, %v546_v49   ;;  %p424_p0 = scmp.ge.s32.totalorder %s427_s5, 8  }
 0x22b   : > { %834 = vmatprep.subr.mxu0 %v987_v38  ;;  %s993_s20 = smov (%p424_p0), 96   ;;  %s1260_s21 = smov (%p424_p0), 0  }
 0x22c   : > { %835 = vmatpush3.msra.mxu0 %v1177_v54  ;;  %v435_v42 = vld [vmem:[%s434_s17] sm:$0xff] }
 0x22d   : > { %836 = vmatprep.subr.mxu0 %v987_v38 }
 0x22e   : > { %837 = vmatpush3.msra.mxu0 %v1172_v53 }
 0x22f   : > { %839 = vmatmul.mubr.msk.f32.vlgmr.msra.gmra.mxu0 %vm255_vm10, %v971_v37 }
 0x2a5   : > { %v549_v4 = vpop.permute.xlu1 %548 }
 0x2a6   : > { %vm550_vm14 = vcmp.eq.s32.totalorder %v549_v4, 1 }
 0x2ef   : > { %v511_v39 = vpop.f32.mrf.mxu0 }
 0x2f0   : > { %v512_v40 = vadd.f32 %v1192_v57, %v511_v39 }
 0x2f1   : > { %v840_v41 = vpop.f32.mrf.mxu0 }
 0x2f2   : > { %523 = vrot.lane.b32.xlu0 %v512_v40, %s989_s8  ;;  %v515_v43 = vadd.f32 %v512_v40, %v435_v42 }
 0x2f4   : > { %v769_v44 = vmul.f32 -1.442695, %v515_v43 }
 0x2f6   : > { %913 = vpow2.f32 %v769_v44 }
 0x303   : > { %v914_v45 = vpop.eup %913 }
 0x304   : > { %v519_v46 = vadd.f32 1.0, %v914_v45 }
 0x306   : > { %915 = vrcp.f32 %v519_v46 }
 0x313   : > { %v916_v50 = vpop.eup %915 }
 0x314   : > { %v533_v6 = vsub.f32 1.0, %v916_v50 }
 0x364   : > { %v524_v63 = vpop.permute.xlu0 %523 }
 0x365   : > { %v526_v0 = vmul.f32 %v916_v50, %v524_v63 }
 0x367   : > { %528 = vrot.lane.b32.xlu0 %v526_v0, %s989_s8 }
 0x36b   : > { %539 = vrot.lane.b32.xlu0 %v971_v37, %s991_s18 }
 0x36f   :  { %557 = vrot.lane.b32.xlu0 (%p424_p0), %v1167_v52, %s993_s20 }
 0x3d9   : > { %v529_v1 = vpop.permute.xlu0 %528 }
 0x3da   : > { %v531_v2 = vadd.f32 %v529_v1, %v435_v42 }
 0x3dc   : > { %917 = vtanh.f32 %v531_v2 }
 0x3dd   : > { %v540_v5 = vpop.permute.xlu0 %539 }
 0x3de   : > { %v542_v8 = vmul.f32 %v916_v50, %v540_v5 }
 0x3e1   :  { %v558_v13 = vpop.permute.xlu0 (%p424_p0), %557  }
 0x3e9   : > { %v918_v3 = vpop.eup %917 }
 0x3ea   : > { %535 = vrot.lane.b32.xlu1 %v918_v3, %s992_s19 }
 0x45c   : > { %v536_v7 = vpop.permute.xlu1 %535 }
 0x45d   : > { %v538_v9 = vmul.f32 %v536_v7, %v533_v6 }
 0x45f   : > { %v543_v10 = vadd.f32 %v542_v8, %v538_v9 }
 0x461   : > { %v551_v11 = vsel %vm550_vm14, %v543_v10, %v540_v5 }
 0x462   : > { %553 = vrot.lane.b32.xlu1 %v551_v11, %s992_s19 }
 0x4d2   :  { %426 = sbr.rel (!%p424_p0) target bundleno = 550 (0x226), region = 76 }
 0x4d4   : > { %v1249_v37 = vpop.permute.xlu1 %553  }
 0x4d5   : > { %v1304_v12 = vmov %v1249_v37 }
 0x4d6   : > { %v1305_v37 = vmov %v1304_v12 }
 0x4d7 LB: > { %v994_v14 = vmov 0.0   ;;  %vm995_vm15 = vmmov 0   ;;  %s996_s22 = smov 96   ;;  %s997_s0 = smov 32   ;;  %v998_v18 = vmov 0   ;;  %s983_s21 = sphi %s1260_s21, %s565_s21   ;;  %v979_v13 = vphi %v558_v13, %v1306_v13  }
 0x4d8   : > { %841 = vmatprep.subr.mxu0 %v994_v14  ;;  %849 = vmatprep.mubr.msk.f32.mxu0 %vm995_vm15, %v994_v14  ;;  %s567_s23 = ssub.s32 7, %s983_s21  ;;  %s999_s26 = smov 64  }
 0x4d9   : > { %842 = vmatpush3.msra.mxu0 %v1212_v61  ;;  %s770_s24 = sshll.u32 %s567_s23, 3  ;;  %919 = vset.pattern.permute.xlu1 %v998_v18  ;;  %v691_v19 = vstv %s567_s23  ;;  %s565_s21 = sadd.s32 1, %s983_s21  }
 0x4da   : > { %843 = vmatprep.subr.mxu0 %v994_v14  ;;  %s569_s1 = sshra.s32 %s770_s24, 3  ;;  %920 = vset.pattern.permute.xlu0 %v998_v18  ;;  %vm692_vm0 = vcmp.gt.s32.totalorder %v1162_v51, %v691_v19  ;;  %p562_p1 = scmp.ge.s32.totalorder %s565_s21, 8  }
 0x4db   : > { %844 = vmatpush3.msra.mxu0 %v1207_v60  ;;  %s778_s25 = sshll.u32 %s569_s1, 4  ;;  %v693_v23 = vsel %vm692_vm0, 1, %v998_v18  ;;  %s1000_s27 = smov (%p562_p1), 32  }
 0x4dc   : > { %845 = vmatprep.subr.mxu0 %v994_v14  ;;  %s573_s2 = scalar_lea.vmem [#allocation2], %s778_s25  ;;  %s1001_s28 = smov (%p562_p1), [#allocation3]  }
 0x4dd   : > { %846 = vmatpush3.msra.mxu0 %v1202_v59  ;;  %v574_v55 = vld [vmem:[%s573_s2] sm:$0xff]  ;;  %v575_v24 = vld [vmem:[%s573_s2 + $0x8] sm:$0xff]  ;;  %s711_s29 = sshll.u32 (%p562_p1), %s1001_s28, 4  ;;  %s712_s29 = int_to_ptr.vmem [resolvable:$true] %s711_s29 }
 0x4de   : > { %847 = vmatprep.subr.mxu0 %v994_v14  ;;  %s931_s3 = scalar_lea.vmem (%p562_p1), %s712_s29, 128  ;;  %p936_p3 = scmp.lt.s32.totalorder (%p562_p1), %s712_s29, %s712_s29 }
 0x4df   : > { %848 = vmatpush3.msra.mxu0 %v1197_v58  ;;  %p932_p2 = scmp.ne.s32.totalorder (%p562_p1), %s712_s29, %s931_s3  ;;  %p937_p4 = scmp.lt.s32.totalorder (%p562_p1), %s931_s3, %s931_s3 }
 0x4e0   : > { %850 = vmatmul.mubr.msk.f32.vlgmr.msra.gmra.mxu0 %vm255_vm10, %v979_v13 }
 0x4e1   :  { %p938_p5 = por (%p562_p1), %p937_p4, %p936_p3 }
 0x4e3   :  { %p939_p6 = pnand (%p562_p1), %p938_p5, %p932_p2 }
 0x5a0   : > { %v651_v52 = vpop.f32.mrf.mxu0 }
 0x5a1   : > { %v652_v53 = vadd.f32 %v1217_v62, %v651_v52 }
 0x5a2   : > { %v851_v54 = vpop.f32.mrf.mxu0 }
 0x5a3   : > { %656 = vrot.lane.b32.xlu0 %v652_v53, %s996_s22 }
 0x5a7   : > { %673 = vrot.lane.b32.xlu0 %v652_v53, %s997_s0 }
 0x615   : > { %v657_v56 = vpop.permute.xlu0 %656 }
 0x616   : > { %v659_v57 = vadd.f32 %v657_v56, %v574_v55  ;;  %v666_v28 = vadd.f32 %v657_v56, %v575_v24 }
 0x618   : > { %v775_v15 = vmul.f32 -1.442695, %v659_v57  ;;  %v776_v29 = vmul.f32 -1.442695, %v666_v28 }
 0x619   : > { %v674_v21 = vpop.permute.xlu0 %673 }
 0x61a   : > { %921 = vpow2.f32 %v775_v15 }
 0x627   : > { %v922_v16 = vpop.eup %921 }
 0x628   : > { %v663_v17 = vadd.f32 1.0, %v922_v16 }
 0x62a   : > { %923 = vrcp.f32 %v663_v17 }
 0x637   : > { %v924_v20 = vpop.eup %923 }
 0x638   : > { %v676_v22 = vmul.f32 %v924_v20, %v674_v21 }
 0x63a   : > { %678 = vrot.lane.b32.xlu1 %v676_v22, %s999_s26 }
 0x63e   : > { %695 = vperm.xlu1 %919, %v693_v23  }
 0x6ac   : > { %v679_v25 = vpop.permute.xlu1 %678 }
 0x6ad   : > { %v681_v26 = vadd.f32 %v679_v25, %v575_v24 }
 0x6af   : > { %925 = vtanh.f32 %v681_v26 }
 0x6b0   : > { %927 = vpow2.f32 %v776_v29 }
 0x6b9   : > { %v696_v34 = vpop.permute.xlu1 %695 }
 0x6ba   : > { %vm697_vm1 = vcmp.eq.s32.totalorder %v696_v34, 1 }
 0x6bc   : > { %v926_v27 = vpop.eup %925 }
 0x6bd   : > { %685 = vrot.lane.b32.xlu0 %v926_v27, %s996_s22  ;;  %v928_v30 = vpop.eup %927 }
 0x6be   : > { %v670_v31 = vadd.f32 1.0, %v928_v30 }
 0x6c0   : > { %929 = vrcp.f32 %v670_v31 }
 0x6cd   : > { %v930_v32 = vpop.eup %929 }
 0x6ce   : > { %v683_v33 = vsub.f32 1.0, %v930_v32  ;;  %v689_v36 = vmul.f32 %v979_v13, %v930_v32 }
 0x72f   : > { %v686_v35 = vpop.permute.xlu0 %685 }
 0x730   : > { %v688_v37 = vmul.f32 %v686_v35, %v683_v33 }
 0x731   :  { %564 = sbr.rel (!%p562_p1) target bundleno = 1239 (0x4d7), region = 87 }
 0x732   : > { %v690_v38 = vadd.f32 %v689_v36, %v688_v37 }
 0x734   : > { %v698_v39 = vsel %vm697_vm1, %v690_v38, %v979_v13  }
 0x735   : > { %v1306_v13 = vmov %v698_v39  ;;  %700 = vrot.lane.b32.xlu0 (%p562_p1), %v698_v39, %s1000_s27 }
 0x7a7   :  { %v701_v40 = vpop.permute.xlu0 %700 }
 0x7a8   :  { %v703_v41 = vsel %vm255_vm10, %v1304_v12, %v701_v40 }
 0x7a9   :  { %704 = vst.msk [vmem:[#allocation3] sm:$0xff] %vm394_vm11, %v703_v41 }
 0x7aa   :  { %942 = shalt.err (!%p939_p6)
}
 0x7ab   :  { %714 = dma.vmem_to_hbm [thread:$0]  %s712_s29, 128, %s1302_s10, [#allocation4]  }
 0x7ac   :  { %967 = dma.done.wait [#allocation4], 128  }
 0x7ad   :  { %968 = vsyncadd [#allocation4], 4294967168 }
 0x7ae   :  { %718 = vsyncpa [#allocation4], 1 }

</bundles_post_ra>
